<compile_context>
chip_gen: v6e
topology: v6e:2x2x1
jax: 0.10.0
libtpu: 0.0.40
codegen_flags: <defaults>
</compile_context>

<pallas_src>
import math
import functools

import jax
import jax.numpy as jnp
from jax.experimental import pallas as pl
from jax.experimental.pallas import tpu as pltpu


def _dotatt_kernel(q_ref, k_ref, v_ref, o_ref, *, scale, fast):
    """One grid step handles a (bt, ...) slab of the batch."""
    compute_dtype = jnp.bfloat16 if fast else jnp.float32

    # Fold 1/sqrt(d) into Q (scales bt*n*d elements once, before the MXU).
    q = (q_ref[...] * scale).astype(compute_dtype)   # (bt, n, d)
    k = k_ref[...].astype(compute_dtype)              # (bt, d, m)

    # score = (Q / sqrt(d)) @ K   -> MXU, f32 accumulation
    s = jnp.einsum("bnd,bdm->bnm", q, k, preferred_element_type=jnp.float32)

    # Numerically-stable softmax over the last axis, kept in f32.
    s = s - jnp.max(s, axis=-1, keepdims=True)
    e = jnp.exp(s)
    denom = jnp.sum(e, axis=-1, keepdims=True)
    # approx=True lowers to the EUP reciprocal (free slot) on the fast path;
    # exact reciprocal on the f32 path to stay within 1e-5 of the reference.
    att = e * pl.reciprocal(denom, approx=fast)       # (bt, n, m)

    # res = att @ V   -> MXU, f32 accumulation
    v = v_ref[...].astype(compute_dtype)               # (bt, m, vdim)
    res = jnp.einsum("bnm,bmv->bnv", att.astype(compute_dtype), v,
                     preferred_element_type=jnp.float32)
    o_ref[...] = res.astype(o_ref.dtype)


def dotatt(K, V, Q, d, *, batch_tile=None, use_bf16=True):
    """Q: (B, n, d), K: (B, d, m), V: (B, m, v) -> (B, n, v)."""
    B, n, dq = Q.shape
    Bk, dk, m = K.shape
    Bv, mv, vdim = V.shape
    assert B == Bk == Bv and dq == dk and m == mv

    # ---- choose how many batch elements to fold into one grid step ----------
    # Rough f32 byte count of one batch element's blocks + score temporaries,
    # doubled for the pipeline's double buffering.
    per_batch_bytes = 4 * (n * dq + dk * m + mv * vdim + n * vdim)
    per_step_extra = 4 * n * m                       # score / softmax temps
    budget = 16 * 1024 * 1024                        # conservative VMEM budget
    if batch_tile is None:
        bt = max(1, min(B, budget // max(1, 2 * per_batch_bytes + per_step_extra)))
        while B % bt:                                # largest divisor of B <= bt
            bt -= 1
    else:
        bt = batch_tile
        assert B % bt == 0
    grid = (B // bt,)

    scale = 1.0 / math.sqrt(d)
    kernel = functools.partial(_dotatt_kernel, scale=scale, fast=use_bf16)

    return pl.pallas_call(
        kernel,
        out_shape=jax.ShapeDtypeStruct((B, n, vdim), Q.dtype),
        grid_spec=pltpu.PrefetchScalarGridSpec(
            num_scalar_prefetch=0,
            grid=grid,
            in_specs=[
                pl.BlockSpec((bt, n, dq), lambda b: (b, 0, 0)),     # Q
                pl.BlockSpec((bt, dk, m), lambda b: (b, 0, 0)),     # K
                pl.BlockSpec((bt, mv, vdim), lambda b: (b, 0, 0)),  # V
            ],
            out_specs=pl.BlockSpec((bt, n, vdim), lambda b: (b, 0, 0)),
        ),
        compiler_params=pltpu.CompilerParams(
            dimension_semantics=("parallel",),        # batch tiles -> megacore
            vmem_limit_bytes=48 * 1024 * 1024,        # explicit, < v7x 64 MiB
        ),
    )(Q, K, V)


def dotatt_ref(K, V, Q, d):
    score = jnp.einsum("bnd,bdm->bnm", Q, K) / math.sqrt(d)
    att = jax.nn.softmax(score, axis=-1)
    return jnp.einsum("bnm,bmv->bnv", att, V)


if __name__ == "__main__":
    # Small shapes consistent with the module's forward.
    B, n, d, m, v = 2, 8, 16, 8, 16

    key = jax.random.PRNGKey(0)
    kq, kk, kv = jax.random.split(key, 3)
    Q = jax.random.normal(kq, (B, n, d), dtype=jnp.float32)
    K = jax.random.normal(kk, (B, d, m), dtype=jnp.float32)
    V = jax.random.normal(kv, (B, m, v), dtype=jnp.float32)

    ref = dotatt_ref(K, V, Q, d)

    # Exact (f32 MXU operand) path: matches the reference tightly.
    out_f32 = jax.block_until_ready(dotatt(K, V, Q, d, use_bf16=False))
    assert out_f32.shape == (B, n, v)
    assert jnp.allclose(out_f32, ref, atol=1e-5, rtol=1e-5)

    # Fast path (bf16 MXU operands, f32 accumulation + f32 softmax).
    out_bf16 = jax.block_until_ready(dotatt(K, V, Q, d, use_bf16=True))
    assert out_bf16.shape == (B, n, v)
    assert jnp.allclose(out_bf16, ref, atol=5e-2, rtol=5e-2)

    print("KERNEL_OK")
</pallas_src>

<mosaic_0001>
module attributes {stable_mosaic.version = 11 : i64} {
  func.func @_dotatt_kernel(%arg0: i32, %arg1: memref<2x8x16xf32, #tpu.memory_space<vmem>>, %arg2: memref<2x16x8xf32, #tpu.memory_space<vmem>>, %arg3: memref<2x8x16xf32, #tpu.memory_space<vmem>>, %arg4: memref<2x8x16xf32, #tpu.memory_space<vmem>>) attributes {dimension_semantics = [#tpu.dimension_semantics<parallel>], iteration_bounds = array<i64: 1>, scalar_prefetch = 0 : i64, scratch_operands = 0 : i64, tpu.core_type = #tpu.core_type<tc>, window_params = [{transform_indices = @transform_0, window_bounds = array<i64: 2, 8, 16>}, {transform_indices = @transform_1, window_bounds = array<i64: 2, 16, 8>}, {transform_indices = @transform_2, window_bounds = array<i64: 2, 8, 16>}, {transform_indices = @transform_3, window_bounds = array<i64: 2, 8, 16>}]} {
    %c0 = arith.constant 0 : index
    %c0_0 = arith.constant 0 : index
    %c0_1 = arith.constant 0 : index
    %0 = vector.load %arg1[%c0, %c0_0, %c0_1] : memref<2x8x16xf32, #tpu.memory_space<vmem>>, vector<2x8x16xf32>
    %cst = arith.constant 2.500000e-01 : f32
    %1 = vector.broadcast %cst : f32 to vector<2x8x16xf32>
    %2 = arith.mulf %0, %1 : vector<2x8x16xf32>
    %c0_2 = arith.constant 0 : index
    %c0_3 = arith.constant 0 : index
    %c0_4 = arith.constant 0 : index
    %3 = vector.load %arg2[%c0_2, %c0_3, %c0_4] : memref<2x16x8xf32, #tpu.memory_space<vmem>>, vector<2x16x8xf32>
    "tpu.trace_start"() <{level = 10 : i32, message = "bnd,bdm->bnm"}> : () -> ()
    %cst_5 = arith.constant dense<0.000000e+00> : vector<2x8x8xf32>
    %4 = tpu.matmul %2, %3, %cst_5 {dimension_numbers = #tpu.dot_dimension_numbers<[2], [1], [1], [2], [0, 0, 0, 1, 1, 2], [0], [0]>} : vector<2x8x16xf32>, vector<2x16x8xf32>, vector<2x8x8xf32> -> vector<2x8x8xf32>
    "tpu.trace_stop"() : () -> ()
    %cst_6 = arith.constant dense<0xFF800000> : vector<2x8xf32>
    %5 = vector.multi_reduction <maximumf>, %4, %cst_6 [2] : vector<2x8x8xf32> to vector<2x8xf32>
    %6 = vector.shape_cast %5 : vector<2x8xf32> to vector<2x8x1xf32>
    %7 = vector.broadcast %6 : vector<2x8x1xf32> to vector<2x8x8xf32>
    %8 = arith.subf %4, %7 : vector<2x8x8xf32>
    %9 = math.exp %8 : vector<2x8x8xf32>
    %cst_7 = arith.constant dense<0.000000e+00> : vector<2x8xf32>
    %10 = vector.multi_reduction <add>, %9, %cst_7 [2] : vector<2x8x8xf32> to vector<2x8xf32>
    %11 = vector.shape_cast %10 : vector<2x8xf32> to vector<2x8x1xf32>
    %12 = tpu.reciprocal %11 : vector<2x8x1xf32> -> vector<2x8x1xf32>
    %13 = vector.broadcast %12 : vector<2x8x1xf32> to vector<2x8x8xf32>
    %14 = arith.mulf %9, %13 : vector<2x8x8xf32>
    %c0_8 = arith.constant 0 : index
    %c0_9 = arith.constant 0 : index
    %c0_10 = arith.constant 0 : index
    %15 = vector.load %arg3[%c0_8, %c0_9, %c0_10] : memref<2x8x16xf32, #tpu.memory_space<vmem>>, vector<2x8x16xf32>
    "tpu.trace_start"() <{level = 10 : i32, message = "bnm,bmv->bnv"}> : () -> ()
    %cst_11 = arith.constant dense<0.000000e+00> : vector<2x8x16xf32>
    %16 = tpu.matmul %14, %15, %cst_11 {dimension_numbers = #tpu.dot_dimension_numbers<[2], [1], [1], [2], [0, 0, 0, 1, 1, 2], [0], [0]>} : vector<2x8x8xf32>, vector<2x8x16xf32>, vector<2x8x16xf32> -> vector<2x8x16xf32>
    "tpu.trace_stop"() : () -> ()
    %c0_12 = arith.constant 0 : index
    %c0_13 = arith.constant 0 : index
    %c0_14 = arith.constant 0 : index
    %17 = vector.load %arg4[%c0_12, %c0_13, %c0_14] : memref<2x8x16xf32, #tpu.memory_space<vmem>>, vector<2x8x16xf32>
    tpu.vector_store %arg4[%c0_12, %c0_13, %c0_14], %16 {strides = array<i32>} : memref<2x8x16xf32, #tpu.memory_space<vmem>>, vector<2x8x16xf32>,
    return
  }
  func.func @transform_0(%arg0: i32) -> (i32, i32, i32) {
    %c0_i32 = arith.constant 0 : i32
    %c0_i32_0 = arith.constant 0 : i32
    %c0_i32_1 = arith.constant 0 : i32
    return %arg0, %c0_i32, %c0_i32_0 : i32, i32, i32
  }
  func.func @transform_1(%arg0: i32) -> (i32, i32, i32) {
    %c0_i32 = arith.constant 0 : i32
    %c0_i32_0 = arith.constant 0 : i32
    %c0_i32_1 = arith.constant 0 : i32
    return %arg0, %c0_i32, %c0_i32_0 : i32, i32, i32
  }
  func.func @transform_2(%arg0: i32) -> (i32, i32, i32) {
    %c0_i32 = arith.constant 0 : i32
    %c0_i32_0 = arith.constant 0 : i32
    %c0_i32_1 = arith.constant 0 : i32
    return %arg0, %c0_i32, %c0_i32_0 : i32, i32, i32
  }
  func.func @transform_3(%arg0: i32) -> (i32, i32, i32) {
    %c0_i32 = arith.constant 0 : i32
    %c0_i32_0 = arith.constant 0 : i32
    %c0_i32_1 = arith.constant 0 : i32
    return %arg0, %c0_i32, %c0_i32_0 : i32, i32, i32
  }
}

</mosaic_0001>

<bundles_post_ra>
// kernel: tpu_custom_call.1
= control target key start
LH: loop header
LB: loop body
LE: loop exit
PB: predicated region body
PF: predicated region fallthrough
CT: control target
= control target key end

     0   :  { %v432_v2 = vmov 0.0   ;;  %vm433_vm0 = vmmov 0   ;;  %vm23_vm1 = vcmask 130048   ;;  %s498_s0 = inlined_call_operand.vmem [shape: f32[2,8,16], index: 0, kind: input, shape index: {}]   ;;  %s499_s1 = inlined_call_operand.vmem [shape: f32[2,16,8], index: 1, kind: input, shape index: {}]   ;;  %s500_s2 = inlined_call_operand.vmem [shape: f32[2,8,16], index: 2, kind: input, shape index: {}]   ;;  %s501_s3 = inlined_call_operand.hbm [shape: f32[2,8,16], index: 3, kind: output, shape index: {}]  }
   0x1   :  { %v20_v0 = vld [vmem:[%s499_s1 + $0x8] sm:$0xff]  ;;  %v22_v1 = vld [vmem:[%s499_s1 + $0x18] sm:$0xff]  ;;  %373 = vmatprep.subr.mxu0 %v432_v2  ;;  %380 = vmatprep.subr.mxu1 %v432_v2  ;;  %v19_v3 = vld [vmem:[%s499_s1] sm:$0xff] }
   0x2   :  { %v15_v4 = vld [vmem:[%s498_s0] sm:$0xff]  ;;  %v16_v5 = vld [vmem:[%s498_s0 + $0x8] sm:$0xff]  ;;  %374 = vmatpush3.msra.mxu0 %v20_v0  ;;  %377 = vmatprep.mubr.msk.f32.mxu0 %vm433_vm0, %v432_v2  ;;  %v21_v7 = vld [vmem:[%s499_s1 + $0x10] sm:$0xff] }
   0x3   :  { %v17_v6 = vmul.f32 0.25, %v15_v4 }
   0x4   :  { %8 = vsyncpa [#allocation3], 0  ;;  %375 = vmatprep.subr.mxu0 %v432_v2  ;;  %381 = vmatpush3.msra.mxu1 %v22_v1  ;;  %v18_v8 = vmul.f32 0.25, %v16_v5  ;;  %vm170_vm2 = vcmask 64512   ;;  %v193_v25 = vld [vmem:[%s500_s2] sm:$0xff]  ;;  %v194_v26 = vld [vmem:[%s500_s2 + $0x8] sm:$0xff] }
   0x5   :  { %376 = vmatpush3.msra.mxu0 %v19_v3  ;;  %382 = vmatprep.subr.mxu1 %v432_v2  ;;  %s434_s26 = smov [#allocation2]  }
   0x6   :  { %378 = vmatmul.mubr.msk.f32.vlgmr.msra.gmra.mxu0 %vm23_vm1, %v17_v6  ;;  %383 = vmatpush3.msra.mxu1 %v21_v7  ;;  %s348_s27 = sshll.u32 %s434_s26, 4  ;;  %s349_s27 = int_to_ptr.vmem [resolvable:$true] %s348_s27 }
   0x7   :  { %384 = vmatprep.mubr.msk.f32.mxu1 %vm433_vm0, %v432_v2  ;;  %387 = vmatprep.subr.mxu0 %v432_v2  ;;  %s410_s2 = scalar_lea.vmem %s349_s27, 256  ;;  %p415_p1 = scmp.lt.s32.totalorder %s349_s27, %s349_s27 }
   0x8   :  { %385 = vmatmul.mubr.msk.f32.vlgmr.msra.gmra.mxu1 %vm23_vm1, %v18_v8  ;;  %389 = vmatprep.mubr.msk.f32.mxu0 %vm433_vm0, %v432_v2  ;;  %p411_p0 = scmp.ne.s32.totalorder %s349_s27, %s410_s2  ;;  %p416_p2 = scmp.lt.s32.totalorder %s410_s2, %s410_s2 }
   0x9   :  { %392 = vmatprep.subr.mxu1 %v432_v2  ;;  %394 = vmatprep.mubr.msk.f32.mxu1 %vm433_vm0, %v432_v2 }
   0xa   :  { %388 = vmatpush3.msra.mxu0 %v193_v25  ;;  %393 = vmatpush3.msra.mxu1 %v194_v26  ;;  %p417_p3 = por %p416_p2, %p415_p1 }
   0xc   :  { %p418_p4 = pnand %p417_p3, %p411_p0 }
  0xc6   :  { %v93_v9 = vpop.f32.mrf.mxu0 }
  0xc7   :  { %v171_v10 = vsel %vm170_vm2, %v93_v9, -inf }
  0xc8   :  { %v166_v11 = vpop.f32.mrf.mxu1  ;;  %172 = vmax.xlane.f32.xlu0 %v171_v10  ;;  %v379_v12 = vpop.f32.mrf.mxu0 }
  0xc9   :  { %v174_v13 = vsel %vm170_vm2, %v166_v11, -inf }
  0xca   :  { %v386_v14 = vpop.f32.mrf.mxu1 }
  0xcc   :  { %175 = vmax.xlane.f32.xlu0 %v174_v13 }
 0x151   :  { %v173_v15 = vpop.xlane.xlu0 %172 }
 0x152   :  { %v177_v16 = vsub.f32 %v93_v9, %v173_v15 }
 0x154   :  { %v179_v17 = vmul.f32 1.442695, %v177_v16 }
 0x155   :  { %v176_v18 = vpop.xlane.xlu0 %175 }
 0x156   :  { %402 = vpow2.f32 %v179_v17  ;;  %v178_v19 = vsub.f32 %v166_v11, %v176_v18 }
 0x158   :  { %v181_v20 = vmul.f32 1.442695, %v178_v19 }
 0x15a   :  { %404 = vpow2.f32 %v181_v20 }
 0x163   :  { %v403_v21 = vpop.eup %402 }
 0x164   :  { %v183_v22 = vsel %vm170_vm2, %v403_v21, 0.0 }
 0x165   :  { %184 = vadd.xlane.f32.xlu1 %v183_v22 }
 0x167   :  { %v405_v23 = vpop.eup %404 }
 0x168   :  { %v186_v24 = vsel %vm170_vm2, %v405_v23, 0.0 }
 0x169   :  { %187 = vadd.xlane.f32.xlu1 %v186_v24 }
 0x1ee   :  { %v185_v27 = vpop.xlane.xlu1 %184 }
 0x1ef   :  { %406 = vrcp.f32 %v185_v27 }
 0x1f2   :  { %v188_v28 = vpop.xlane.xlu1 %187 }
 0x1f3   :  { %408 = vrcp.f32 %v188_v28 }
 0x1fc   :  { %v407_v29 = vpop.eup %406 }
 0x1fd   :  { %v191_v30 = vmul.f32 %v407_v29, %v403_v21 }
 0x1ff   :  { %390 = vmatmul.mubr.msk.f32.vlgmr.msra.gmra.mxu0 %vm170_vm2, %v191_v30 }
 0x200   :  { %v409_v31 = vpop.eup %408 }
 0x201   :  { %v192_v32 = vmul.f32 %v409_v31, %v405_v23 }
 0x203   :  { %395 = vmatmul.mubr.msk.f32.vlgmr.msra.gmra.mxu1 %vm170_vm2, %v192_v32 }
 0x2bf   :  { %v264_v33 = vpop.f32.mrf.mxu0 }
 0x2c0   :  { %341 = vst.msk [vmem:[#allocation2] sm:$0xff] %vm23_vm1, %v264_v33 }
 0x2c1   :  { %v391_v34 = vpop.f32.mrf.mxu0 }
 0x2c3   :  { %v337_v35 = vpop.f32.mrf.mxu1 }
 0x2c4   :  { %342 = vst.msk [vmem:[#allocation2 + $0x8] sm:$0xff] %vm23_vm1, %v337_v35 }
 0x2c5   :  { %v396_v36 = vpop.f32.mrf.mxu1 }
 0x2c6   :  { %421 = shalt.err (!%p418_p4)
}
 0x2c7   :  { %s435_s28 = smov 128   ;;  %s436_s29 = smov 8  }
 0x2c8   :  { %354 = dma.vmem_to_hbm [thread:$0]  %s349_s27, 256, %s501_s3, [#allocation3], %s435_s28, %s435_s28, %s436_s29  }
 0x2c9   :  { %430 = dma.done.wait [#allocation3], 256  }
 0x2ca   :  { %431 = vsyncadd [#allocation3], 4294967040 }
 0x2cb   :  { %358 = vsyncpa [#allocation3], 1 }

</bundles_post_ra>
